<compile_context>
chip_gen: v7x
topology: tpu7x:2x2x1
jax: 0.10.0
libtpu: 0.0.40
codegen_flags: <defaults>
</compile_context>

<pallas_src>
import functools
import math

import jax
import jax.numpy as jnp
from jax import lax
from jax.experimental import pallas as pl
from jax.experimental.pallas import tpu as pltpu


def _wnconv_kernel(style_ref, x_ref, wmod_ref, bmod_ref, wpw_ref, wdwm_ref,
                   o_ref, *, scale, shifts):
    # style_ref: (NB, 1, S)        style vectors for this batch block
    # x_ref    : (NB, Cin, HW)     input, H*W merged onto the lane axis
    # wmod_ref : (S, Cin)          modulation weight (pre-transposed)
    # bmod_ref : (1, Cin)          modulation bias
    # wpw_ref  : (Cout, Cin)       effective weight-normed 1x1 weight
    # wdwm_ref : (k*k, Cout, HW)   depthwise weight per tap, pre-multiplied with
    #                              that tap's "same"-padding border mask
    # o_ref    : (NB, Cout, HW)    output, H*W on lanes (lane-dense stores)
    nb, cin, hw = x_ref.shape

    # ---- modulation linear + scale: mstyle = (style @ Wmod^T + b) * scale
    style = style_ref[:, 0, :].astype(jnp.float32)                    # (NB, S)
    mstyle = (jnp.dot(style, wmod_ref[...],
                      preferred_element_type=jnp.float32)
              + bmod_ref[...]) * scale                                # (NB, Cin)

    # ---- fold the modulation into a per-image pointwise weight:
    #      (x * mstyle) @ Wpw^T == x @ (mstyle * Wpw)^T   -> no scaled-x temp
    w_eff = mstyle[:, None, :] * wpw_ref[...][None, :, :]             # (NB, Cout, Cin)

    # ---- pointwise 1x1 conv: batched contraction over Cin, HW stays on lanes.
    #      (Channel counts are tiny, so the MXU is mostly idle, but the kernel
    #      is HBM-bound and this is off the critical path.)
    x = x_ref[...].astype(jnp.float32)                                # (NB, Cin, HW)
    y = lax.dot_general(w_eff, x, (((2,), (1,)), ((0,), (0,))),
                        preferred_element_type=jnp.float32)           # (NB, Cout, HW)

    # ---- depthwise kxk "same" conv: each tap is a lane roll (XLU) of y and one
    #      multiply-add against the pre-masked per-tap weight (VPU).  The masks
    #      zero out elements that wrap across row/column borders.
    acc = None
    for t, s in enumerate(shifts):
        yt = y if s == 0 else pltpu.roll(y, shift=(-s) % hw, axis=2)
        term = yt * wdwm_ref[t]                      # (Cout, HW) broadcast over NB
        acc = term if acc is None else acc + term
    o_ref[...] = acc.astype(o_ref.dtype)


def _vmem_capacity_bytes(default=64 * 1024 * 1024):
    try:
        return int(pltpu.get_tpu_info().vmem_capacity_bytes)
    except Exception:
        return default


def wnconv2d_small(x, style, params, *, kernel_size=3, nb=None,
                   vmem_limit_bytes=None):
    """x: (N, Cin, H, W) float32 (NCHW, PyTorch layout); style: (N, style_dim).
    Returns (N, Cout, H, W), matching the PyTorch module's forward.
    Odd kernel_size only (PyTorch pads asymmetrically for even k)."""
    w_mod, b_mod, w_pw, w_dw = params
    n, c_in, h, w = x.shape
    s_dim = style.shape[1]
    c_out = w_pw.shape[0]
    k = kernel_size
    # TODO(synk): even kernel_size needs asymmetric padding (PyTorch semantics);
    # only odd k is supported here.
    assert k % 2 == 1, "odd kernel_size only"
    pad = k // 2
    hw = h * w
    scale = 1.0 / math.sqrt(c_in * k * k)

    # --- host-side plumbing: reshapes only (free bitcasts), NO transpose / pad
    x_flat = x.reshape(n, c_in, hw)
    style3 = style.reshape(n, 1, s_dim)
    w_mod_t = jnp.transpose(w_mod)                                   # (S, Cin)  tiny
    b_mod2 = b_mod.reshape(1, c_in)
    w_pw2 = w_pw.reshape(c_out, c_in)                                # (Cout, Cin)

    # Per-tap depthwise weight folded with that tap's "same"-padding border
    # mask (so the in-kernel depthwise is one fused multiply-add per tap).
    ii = jnp.arange(h)[:, None]
    jj = jnp.arange(w)[None, :]
    shifts, masks = [], []
    for di in range(-pad, pad + 1):
        for dj in range(-pad, pad + 1):
            shifts.append(di * w + dj)
            valid = ((ii + di >= 0) & (ii + di < h) &
                     (jj + dj >= 0) & (jj + dj < w))
            masks.append(valid.reshape(hw).astype(jnp.float32))
    mask = jnp.stack(masks)                                          # (k*k, HW)
    w_dw_t = jnp.transpose(w_dw.reshape(c_out, k * k))               # (k*k, Cout)
    w_dw_masked = w_dw_t[:, :, None] * mask[:, None, :]              # (k*k, Cout, HW)

    # --- generation-aware VMEM limit and batch block
    vmem_cap = _vmem_capacity_bytes()
    if vmem_limit_bytes is None:
        # ~0.5x physical VMEM: ~32 MiB on v7x (64 MiB/TC), ~64 MiB on v5e/v6e.
        vmem_limit_bytes = max(32 * 1024 * 1024,
                               min(vmem_cap // 2, 96 * 1024 * 1024))
    if nb is None:
        # per-image resident bytes: double-buffered in + out blocks plus ~3
        # full-size f32 temporaries (y, acc, rolled tap) inside the kernel.
        per_img = 4 * hw * (2 * c_in + 5 * c_out)
        budget = min(vmem_cap // 6, 16 * 1024 * 1024)
        nb = max(1, min(budget // max(per_img, 1), 128))
        if n >= 4:                        # >= 2 grid steps per v7x TensorCore
            nb = min(nb, n // 4)
        elif n >= 2:                      # keep the input/output pipeline alive
            nb = min(nb, n // 2)
        nb = max(1, min(nb, n))
    grid = (pl.cdiv(n, nb),)              # tail block handled by Pallas masking

    full = lambda a: pl.BlockSpec(a.shape, lambda b: (0,) * a.ndim)

    flops = n * (2 * s_dim * c_in + c_in * c_out
                 + 2 * c_in * c_out * hw + 2 * c_out * hw * k * k)
    bytes_accessed = 4 * (x_flat.size + n * c_out * hw + style3.size
                          + w_mod_t.size + b_mod2.size + w_pw2.size
                          + w_dw_masked.size)

    kernel = functools.partial(_wnconv_kernel, scale=scale, shifts=tuple(shifts))

    out_flat = pl.pallas_call(
        kernel,
        out_shape=jax.ShapeDtypeStruct((n, c_out, hw), x.dtype),
        grid_spec=pltpu.PrefetchScalarGridSpec(
            num_scalar_prefetch=0,
            grid=grid,
            in_specs=[
                pl.BlockSpec((nb, 1, s_dim), lambda b: (b, 0, 0)),    # style
                pl.BlockSpec((nb, c_in, hw), lambda b: (b, 0, 0)),    # x
                full(w_mod_t), full(b_mod2), full(w_pw2), full(w_dw_masked),
            ],
            out_specs=pl.BlockSpec((nb, c_out, hw), lambda b: (b, 0, 0)),
        ),
        compiler_params=pltpu.CompilerParams(
            dimension_semantics=("parallel",),
            vmem_limit_bytes=int(vmem_limit_bytes)),
        cost_estimate=pl.CostEstimate(
            flops=int(flops), transcendentals=0,
            bytes_accessed=int(bytes_accessed)),
    )(style3, x_flat, w_mod_t, b_mod2, w_pw2, w_dw_masked)

    return out_flat.reshape(n, c_out, h, w)


# ----------------------- parameters & pure-JAX reference -----------------------

def _weight_norm(v, g):
    # nn.utils.weight_norm default (dim=0): w = g * v / ||v||, norm per output
    # channel over all remaining dims.  Parameterization only -> the effective
    # weight is folded host-side once, never inside the grid.
    norm = jnp.sqrt(jnp.sum(v * v, axis=tuple(range(1, v.ndim)), keepdims=True))
    return g.reshape((-1,) + (1,) * (v.ndim - 1)) * v / norm


def init_params(key, c_in, c_out, style_dim, kernel_size):
    k1, k2, k3, k4, k5, k6 = jax.random.split(key, 6)
    # modulation: nn.Linear(style_dim, c_in, bias=True)
    w_mod = jax.random.normal(k1, (c_in, style_dim), jnp.float32) / math.sqrt(style_dim)
    b_mod = jax.random.normal(k2, (c_in,), jnp.float32) * 0.1
    # convpw: weight_norm(Conv2d(c_in, c_out, 1, bias=False))
    v_pw = jax.random.normal(k3, (c_out, c_in, 1, 1), jnp.float32) / math.sqrt(c_in)
    g_pw = 1.0 + 0.1 * jax.random.normal(k4, (c_out,), jnp.float32)
    w_pw = _weight_norm(v_pw, g_pw)
    # convdw: weight_norm(Conv2d(c_out, c_out, k, padding=k//2, groups=c_out, bias=False))
    v_dw = jax.random.normal(k5, (c_out, 1, kernel_size, kernel_size),
                             jnp.float32) / kernel_size
    g_dw = 1.0 + 0.1 * jax.random.normal(k6, (c_out,), jnp.float32)
    w_dw = _weight_norm(v_dw, g_dw)
    return (w_mod, b_mod, w_pw, w_dw)


def wnconv2d_small_ref(x, style, params, kernel_size=3):
    """Pure-JAX reference of the PyTorch forward."""
    w_mod, b_mod, w_pw, w_dw = params
    n, c_in, h, w = x.shape
    c_out = w_pw.shape[0]
    k = kernel_size
    pad = k // 2
    scale = 1.0 / math.sqrt(c_in * k * k)
    mstyle = (style @ w_mod.T + b_mod) * scale                        # (N, Cin)
    xs = x * mstyle[:, :, None, None]
    y = lax.conv_general_dilated(xs, w_pw, (1, 1), 'VALID',
                                 dimension_numbers=('NCHW', 'OIHW', 'NCHW'))
    out = lax.conv_general_dilated(y, w_dw, (1, 1),
                                   [(pad, pad), (pad, pad)],
                                   dimension_numbers=('NCHW', 'OIHW', 'NCHW'),
                                   feature_group_count=c_out)
    return out


if __name__ == "__main__":
    key = jax.random.PRNGKey(0)
    kx, ks, kp = jax.random.split(key, 3)

    N, C_IN, C_OUT, H, W = 2, 4, 8, 16, 16
    STYLE_DIM, KSIZE = 8, 3

    x = jax.random.normal(kx, (N, C_IN, H, W), jnp.float32)
    style = jax.random.normal(ks, (N, STYLE_DIM), jnp.float32)
    params = init_params(kp, C_IN, C_OUT, STYLE_DIM, KSIZE)

    out = wnconv2d_small(x, style, params, kernel_size=KSIZE)
    out = jax.block_until_ready(out)

    ref = wnconv2d_small_ref(x, style, params, kernel_size=KSIZE)
    assert out.shape == (N, C_OUT, H, W)
    assert jnp.allclose(out, ref, atol=1e-3, rtol=1e-3), "mismatch vs reference"

    print("KERNEL_OK")
</pallas_src>

<mosaic_0001>
module attributes {stable_mosaic.version = 11 : i64} {
  func.func @_wnconv_kernel(%arg0: i32, %arg1: memref<1x1x8xf32, #tpu.memory_space<vmem>>, %arg2: memref<1x4x256xf32, #tpu.memory_space<vmem>>, %arg3: memref<8x4xf32, #tpu.memory_space<vmem>>, %arg4: memref<1x4xf32, #tpu.memory_space<vmem>>, %arg5: memref<8x4xf32, #tpu.memory_space<vmem>>, %arg6: memref<9x8x256xf32, #tpu.memory_space<vmem>>, %arg7: memref<1x8x256xf32, #tpu.memory_space<vmem>>) attributes {dimension_semantics = [#tpu.dimension_semantics<parallel>], iteration_bounds = array<i64: 2>, scalar_prefetch = 0 : i64, scratch_operands = 0 : i64, tpu.core_type = #tpu.core_type<tc>, window_params = [{transform_indices = @transform_0, window_bounds = array<i64: 1, 1, 8>}, {transform_indices = @transform_1, window_bounds = array<i64: 1, 4, 256>}, {pipeline_mode = #tpu.pipeline_mode<synchronous>, transform_indices = @transform_2, window_bounds = array<i64: 8, 4>}, {pipeline_mode = #tpu.pipeline_mode<synchronous>, transform_indices = @transform_3, window_bounds = array<i64: 1, 4>}, {pipeline_mode = #tpu.pipeline_mode<synchronous>, transform_indices = @transform_4, window_bounds = array<i64: 8, 4>}, {pipeline_mode = #tpu.pipeline_mode<synchronous>, transform_indices = @transform_5, window_bounds = array<i64: 9, 8, 256>}, {transform_indices = @transform_6, window_bounds = array<i64: 1, 8, 256>}]} {
    %c0 = arith.constant 0 : index
    %c0_0 = arith.constant 0 : index
    %c0_1 = arith.constant 0 : index
    %0 = vector.load %arg1[%c0, %c0_0, %c0_1] : memref<1x1x8xf32, #tpu.memory_space<vmem>>, vector<1x1x8xf32>
    %1 = vector.shape_cast %0 : vector<1x1x8xf32> to vector<1x8xf32>
    %c0_2 = arith.constant 0 : index
    %c0_3 = arith.constant 0 : index
    %2 = vector.load %arg3[%c0_2, %c0_3] : memref<8x4xf32, #tpu.memory_space<vmem>>, vector<8x4xf32>
    %cst = arith.constant dense<0.000000e+00> : vector<1x4xf32>
    %3 = tpu.matmul %1, %2, %cst {dimension_numbers = #tpu.dot_dimension_numbers<[1], [0], [0], [1], [0, 0, 1, 1], [], []>} : vector<1x8xf32>, vector<8x4xf32>, vector<1x4xf32> -> vector<1x4xf32>
    %c0_4 = arith.constant 0 : index
    %c0_5 = arith.constant 0 : index
    %4 = vector.load %arg4[%c0_4, %c0_5] : memref<1x4xf32, #tpu.memory_space<vmem>>, vector<1x4xf32>
    %5 = arith.addf %3, %4 : vector<1x4xf32>
    %cst_6 = arith.constant 0.166666672 : f32
    %6 = vector.broadcast %cst_6 : f32 to vector<1x4xf32>
    %7 = arith.mulf %5, %6 : vector<1x4xf32>
    %8 = vector.shape_cast %7 : vector<1x4xf32> to vector<1x1x4xf32>
    %c0_7 = arith.constant 0 : index
    %c0_8 = arith.constant 0 : index
    %9 = vector.load %arg5[%c0_7, %c0_8] : memref<8x4xf32, #tpu.memory_space<vmem>>, vector<8x4xf32>
    %10 = vector.shape_cast %9 : vector<8x4xf32> to vector<1x8x4xf32>
    %11 = vector.broadcast %8 : vector<1x1x4xf32> to vector<1x8x4xf32>
    %12 = arith.mulf %11, %10 : vector<1x8x4xf32>
    %c0_9 = arith.constant 0 : index
    %c0_10 = arith.constant 0 : index
    %c0_11 = arith.constant 0 : index
    %13 = vector.load %arg2[%c0_9, %c0_10, %c0_11] : memref<1x4x256xf32, #tpu.memory_space<vmem>>, vector<1x4x256xf32>
    %cst_12 = arith.constant dense<0.000000e+00> : vector<1x8x256xf32>
    %14 = tpu.matmul %12, %13, %cst_12 {dimension_numbers = #tpu.dot_dimension_numbers<[2], [1], [1], [2], [0, 0, 0, 1, 1, 2], [0], [0]>} : vector<1x8x4xf32>, vector<1x4x256xf32>, vector<1x8x256xf32> -> vector<1x8x256xf32>
    %c17_i32 = arith.constant 17 : i32
    %15 = tpu.dynamic_rotate %14 by %c17_i32 dim 2 : vector<1x8x256xf32>, i32 -> vector<1x8x256xf32>
    %c0_13 = arith.constant 0 : index
    %c0_14 = arith.constant 0 : index
    %c0_15 = arith.constant 0 : index
    %16 = vector.load %arg6[%c0_13, %c0_14, %c0_15] : memref<9x8x256xf32, #tpu.memory_space<vmem>>, vector<1x8x256xf32>
    %17 = vector.shape_cast %16 : vector<1x8x256xf32> to vector<8x256xf32>
    %18 = vector.shape_cast %17 : vector<8x256xf32> to vector<1x8x256xf32>
    %19 = arith.mulf %15, %18 : vector<1x8x256xf32>
    %c16_i32 = arith.constant 16 : i32
    %20 = tpu.dynamic_rotate %14 by %c16_i32 dim 2 : vector<1x8x256xf32>, i32 -> vector<1x8x256xf32>
    %c1 = arith.constant 1 : index
    %c0_16 = arith.constant 0 : index
    %c0_17 = arith.constant 0 : index
    %21 = vector.load %arg6[%c1, %c0_16, %c0_17] : memref<9x8x256xf32, #tpu.memory_space<vmem>>, vector<1x8x256xf32>
    %22 = vector.shape_cast %21 : vector<1x8x256xf32> to vector<8x256xf32>
    %23 = vector.shape_cast %22 : vector<8x256xf32> to vector<1x8x256xf32>
    %24 = arith.mulf %20, %23 : vector<1x8x256xf32>
    %25 = arith.addf %19, %24 : vector<1x8x256xf32>
    %c15_i32 = arith.constant 15 : i32
    %26 = tpu.dynamic_rotate %14 by %c15_i32 dim 2 : vector<1x8x256xf32>, i32 -> vector<1x8x256xf32>
    %c2 = arith.constant 2 : index
    %c0_18 = arith.constant 0 : index
    %c0_19 = arith.constant 0 : index
    %27 = vector.load %arg6[%c2, %c0_18, %c0_19] : memref<9x8x256xf32, #tpu.memory_space<vmem>>, vector<1x8x256xf32>
    %28 = vector.shape_cast %27 : vector<1x8x256xf32> to vector<8x256xf32>
    %29 = vector.shape_cast %28 : vector<8x256xf32> to vector<1x8x256xf32>
    %30 = arith.mulf %26, %29 : vector<1x8x256xf32>
    %31 = arith.addf %25, %30 : vector<1x8x256xf32>
    %c1_i32 = arith.constant 1 : i32
    %32 = tpu.dynamic_rotate %14 by %c1_i32 dim 2 : vector<1x8x256xf32>, i32 -> vector<1x8x256xf32>
    %c3 = arith.constant 3 : index
    %c0_20 = arith.constant 0 : index
    %c0_21 = arith.constant 0 : index
    %33 = vector.load %arg6[%c3, %c0_20, %c0_21] : memref<9x8x256xf32, #tpu.memory_space<vmem>>, vector<1x8x256xf32>
    %34 = vector.shape_cast %33 : vector<1x8x256xf32> to vector<8x256xf32>
    %35 = vector.shape_cast %34 : vector<8x256xf32> to vector<1x8x256xf32>
    %36 = arith.mulf %32, %35 : vector<1x8x256xf32>
    %37 = arith.addf %31, %36 : vector<1x8x256xf32>
    %c4 = arith.constant 4 : index
    %c0_22 = arith.constant 0 : index
    %c0_23 = arith.constant 0 : index
    %38 = vector.load %arg6[%c4, %c0_22, %c0_23] : memref<9x8x256xf32, #tpu.memory_space<vmem>>, vector<1x8x256xf32>
    %39 = vector.shape_cast %38 : vector<1x8x256xf32> to vector<8x256xf32>
    %40 = vector.shape_cast %39 : vector<8x256xf32> to vector<1x8x256xf32>
    %41 = arith.mulf %14, %40 : vector<1x8x256xf32>
    %42 = arith.addf %37, %41 : vector<1x8x256xf32>
    %c255_i32 = arith.constant 255 : i32
    %43 = tpu.dynamic_rotate %14 by %c255_i32 dim 2 : vector<1x8x256xf32>, i32 -> vector<1x8x256xf32>
    %c5 = arith.constant 5 : index
    %c0_24 = arith.constant 0 : index
    %c0_25 = arith.constant 0 : index
    %44 = vector.load %arg6[%c5, %c0_24, %c0_25] : memref<9x8x256xf32, #tpu.memory_space<vmem>>, vector<1x8x256xf32>
    %45 = vector.shape_cast %44 : vector<1x8x256xf32> to vector<8x256xf32>
    %46 = vector.shape_cast %45 : vector<8x256xf32> to vector<1x8x256xf32>
    %47 = arith.mulf %43, %46 : vector<1x8x256xf32>
    %48 = arith.addf %42, %47 : vector<1x8x256xf32>
    %c241_i32 = arith.constant 241 : i32
    %49 = tpu.dynamic_rotate %14 by %c241_i32 dim 2 : vector<1x8x256xf32>, i32 -> vector<1x8x256xf32>
    %c6 = arith.constant 6 : index
    %c0_26 = arith.constant 0 : index
    %c0_27 = arith.constant 0 : index
    %50 = vector.load %arg6[%c6, %c0_26, %c0_27] : memref<9x8x256xf32, #tpu.memory_space<vmem>>, vector<1x8x256xf32>
    %51 = vector.shape_cast %50 : vector<1x8x256xf32> to vector<8x256xf32>
    %52 = vector.shape_cast %51 : vector<8x256xf32> to vector<1x8x256xf32>
    %53 = arith.mulf %49, %52 : vector<1x8x256xf32>
    %54 = arith.addf %48, %53 : vector<1x8x256xf32>
    %c240_i32 = arith.constant 240 : i32
    %55 = tpu.dynamic_rotate %14 by %c240_i32 dim 2 : vector<1x8x256xf32>, i32 -> vector<1x8x256xf32>
    %c7 = arith.constant 7 : index
    %c0_28 = arith.constant 0 : index
    %c0_29 = arith.constant 0 : index
    %56 = vector.load %arg6[%c7, %c0_28, %c0_29] : memref<9x8x256xf32, #tpu.memory_space<vmem>>, vector<1x8x256xf32>
    %57 = vector.shape_cast %56 : vector<1x8x256xf32> to vector<8x256xf32>
    %58 = vector.shape_cast %57 : vector<8x256xf32> to vector<1x8x256xf32>
    %59 = arith.mulf %55, %58 : vector<1x8x256xf32>
    %60 = arith.addf %54, %59 : vector<1x8x256xf32>
    %c239_i32 = arith.constant 239 : i32
    %61 = tpu.dynamic_rotate %14 by %c239_i32 dim 2 : vector<1x8x256xf32>, i32 -> vector<1x8x256xf32>
    %c8 = arith.constant 8 : index
    %c0_30 = arith.constant 0 : index
    %c0_31 = arith.constant 0 : index
    %62 = vector.load %arg6[%c8, %c0_30, %c0_31] : memref<9x8x256xf32, #tpu.memory_space<vmem>>, vector<1x8x256xf32>
    %63 = vector.shape_cast %62 : vector<1x8x256xf32> to vector<8x256xf32>
    %64 = vector.shape_cast %63 : vector<8x256xf32> to vector<1x8x256xf32>
    %65 = arith.mulf %61, %64 : vector<1x8x256xf32>
    %66 = arith.addf %60, %65 : vector<1x8x256xf32>
    %c0_32 = arith.constant 0 : index
    %c0_33 = arith.constant 0 : index
    %c0_34 = arith.constant 0 : index
    %67 = vector.load %arg7[%c0_32, %c0_33, %c0_34] : memref<1x8x256xf32, #tpu.memory_space<vmem>>, vector<1x8x256xf32>
    tpu.vector_store %arg7[%c0_32, %c0_33, %c0_34], %66 {strides = array<i32>} : memref<1x8x256xf32, #tpu.memory_space<vmem>>, vector<1x8x256xf32>,
    return
  }
  func.func @transform_0(%arg0: i32) -> (i32, i32, i32) {
    %c0_i32 = arith.constant 0 : i32
    %c0_i32_0 = arith.constant 0 : i32
    %c0_i32_1 = arith.constant 0 : i32
    return %arg0, %c0_i32, %c0_i32_0 : i32, i32, i32
  }
  func.func @transform_1(%arg0: i32) -> (i32, i32, i32) {
    %c0_i32 = arith.constant 0 : i32
    %c0_i32_0 = arith.constant 0 : i32
    %c0_i32_1 = arith.constant 0 : i32
    return %arg0, %c0_i32, %c0_i32_0 : i32, i32, i32
  }
  func.func @transform_2(%arg0: i32) -> (i32, i32) {
    %c0_i32 = arith.constant 0 : i32
    %c0_i32_0 = arith.constant 0 : i32
    %c0_i32_1 = arith.constant 0 : i32
    return %c0_i32, %c0_i32_0 : i32, i32
  }
  func.func @transform_3(%arg0: i32) -> (i32, i32) {
    %c0_i32 = arith.constant 0 : i32
    %c0_i32_0 = arith.constant 0 : i32
    %c0_i32_1 = arith.constant 0 : i32
    return %c0_i32, %c0_i32_0 : i32, i32
  }
  func.func @transform_4(%arg0: i32) -> (i32, i32) {
    %c0_i32 = arith.constant 0 : i32
    %c0_i32_0 = arith.constant 0 : i32
    %c0_i32_1 = arith.constant 0 : i32
    return %c0_i32, %c0_i32_0 : i32, i32
  }
  func.func @transform_5(%arg0: i32) -> (i32, i32, i32) {
    %c0_i32 = arith.constant 0 : i32
    %c0_i32_0 = arith.constant 0 : i32
    %c0_i32_1 = arith.constant 0 : i32
    %c0_i32_2 = arith.constant 0 : i32
    return %c0_i32, %c0_i32_0, %c0_i32_1 : i32, i32, i32
  }
  func.func @transform_6(%arg0: i32) -> (i32, i32, i32) {
    %c0_i32 = arith.constant 0 : i32
    %c0_i32_0 = arith.constant 0 : i32
    %c0_i32_1 = arith.constant 0 : i32
    return %arg0, %c0_i32, %c0_i32_0 : i32, i32, i32
  }
}

</mosaic_0001>

<bundles_post_ra>
// kernel: tpu_custom_call.1
= control target key start
LH: loop header
LB: loop body
LE: loop exit
PB: predicated region body
PF: predicated region fallthrough
CT: control target
= control target key end

     0   :  { %11 = vsyncpa [#allocation3], 0  ;;  %s1091_s0 = inlined_call_operand.vmem [shape: f32[2,1,8], index: 0, kind: input, shape index: {}]   ;;  %s1092_s1 = inlined_call_operand.vmem [shape: f32[2,4,256], index: 1, kind: input, shape index: {}]   ;;  %s1093_s2 = inlined_call_operand.vmem [shape: f32[8,4], index: 2, kind: input, shape index: {}]   ;;  %s1094_s3 = inlined_call_operand.vmem [shape: f32[1,4], index: 3, kind: input, shape index: {}]   ;;  %s1095_s4 = inlined_call_operand.vmem [shape: f32[8,4], index: 4, kind: input, shape index: {}]   ;;  %s1096_s5 = inlined_call_operand.hbm [shape: f32[9,8,256], index: 5, kind: input, shape index: {}]   ;;  %s1097_s6 = inlined_call_operand.hbm [shape: f32[2,8,256], index: 6, kind: output, shape index: {}]  }
   0x1   :  { %12 = vsyncpa [#allocation4], 0 }
   0x2   :  { %14 = vsyncpa [#allocation4 + $0x1], 0  ;;  %s896_s21 = smov 0   ;;  %s898_s22 = smov 0  }
   0x3   :  { %s900_s23 = smov 0   ;;  %s902_s24 = smov 0  }
   0x4 LB: > { %s917_s25 = sadd.s32 4294967295, %s845_s24   ;;  %s661_s26 = sadd.s32 4294967294, %s845_s24   ;;  %s845_s24 = sphi %s902_s24, %s1113_s24   ;;  %s841_s23 = sphi %s900_s23, %s1112_s23   ;;  %s837_s22 = sphi %s898_s22, %s1111_s22   ;;  %s833_s21 = sphi %s896_s21, %s1110_s21  }
   0x5   : > { %s921_s27 = sadd.s32 1, %s845_s24   ;;  %s163_s28 = sadd.s32 1, %s841_s23 }
   0x6   : > { %s160_s29 = ssub.s32 %s845_s24, %s921_s27  ;;  %p173_p0 = scmp.ne.s32.totalorder %s841_s23, %s837_s22 }
   0x7   : > { %p161_p1 = scmp.eq.s32.totalorder %s160_s29, 0  ;;  %p174_p2 = scmp.eq.s32.totalorder %s917_s25, 1 }
   0x8   : > { %p179_p3 = scmp.ne.s32.totalorder %s837_s22, %s833_s21  ;;  %p180_p4 = scmp.eq.s32.totalorder %s661_s26, 1 }
   0x9   : > { %s932_s30 = scalar_select %p161_p1, %s841_s23, %s163_s28  }
   0xa   : > { %p934_p5 = por %p174_p2, %p173_p0  ;;  %p938_p6 = por %p180_p4, %p179_p3 }
   0xb   : > { %p662_p7 = scmp.ge.s32.totalorder %s845_s24, 1  ;;  %p187_p8 = scmp.lt.s32.totalorder %s845_s24, 3 }
   0xc   : > { %s1101_s7 = scalar_select %p934_p5, 1, 0 }
   0xd   : > { %s1102_s8 = scalar_select %p938_p6, 1, 0 }
   0xe   : > { %p1098_p9 = scmp.eq.s32.totalorder %s917_s25, 0  ;;  %p945_p10 = pnand %p662_p7, %p187_p8 }
   0xf   : > { %s847_s10 = smov [#allocation2]   ;;  %s751_s15 = scalar_lea.hbm %s1096_s5, 2304 }
  0x10   : > { %s1103_s9 = scalar_select %p945_p10, 1, 0 }
  0x11   : > { %s208_s11 = sshll.u32 %s847_s10, 4  ;;  %p694_p11 = pneg %p945_p10  ;;  %s209_s11 = int_to_ptr.vmem [resolvable:$true] %s208_s11 }
  0x12   : > { %p752_p13 = scmp.ne.s32.totalorder %s1096_s5, %s751_s15  ;;  %p758_p3 = scmp.lt.u32.totalorder %s751_s15, %s1096_s5 }
  0x13   : > { %p953_p12 = pnand %p1098_p9, %p694_p11 }
  0x15   : > { %p753_p0 = pneg %p953_p12 }
  0x17   : > { %p754_p1 = pnand %p753_p0, %p752_p13 }
  0x19   : > { %p755_p2 = pneg %p754_p1 }
  0x1b   : > { %p760_p4 = pnand %p758_p3, %p755_p2 }
  0x1d   : > { %763 = shalt.err (!%p760_p4)
}
  0x1e   : > { %s764_s20 = scalar_lea.vmem %s209_s11, 2304  ;;  %p772_p9 = scmp.lt.s32.totalorder %s209_s11, %s209_s11 }
  0x1f   : > { %p765_p7 = scmp.ne.s32.totalorder %s209_s11, %s764_s20  ;;  %p773_p6 = scmp.lt.s32.totalorder %s764_s20, %s764_s20 }
  0x21   : > { %p767_p8 = pnand %p765_p7, %p753_p0  ;;  %p774_p5 = por %p773_p6, %p772_p9 }
  0x23   : > { %p768_p11 = pneg %p767_p8 }
  0x25   : > { %p775_p10 = pnand %p774_p5, %p768_p11 }
  0x27   : > { %778 = shalt.err (!%p775_p10)
}
  0x28   : > { %s848_s26 = smov 256   ;;  %s849_s28 = smov 16  }
  0x29   : > { %697 = dma.hbm_to_vmem [thread:$0]  (!%p953_p12), %s1096_s5, 2304, %s209_s11, [#allocation3], %s848_s26, %s848_s26, %s849_s28  }
  0x2a   : > { %p1105_p13 = scmp.ne.s32.totalorder %s1103_s9, 0 }
  0x2b   : > { %p1106_p1 = scmp.eq.s32.totalorder (!%p1105_p13), %s917_s25, 0 }
  0x2c   : > { %238 = sbr.rel (%p1105_p13) target bundleno = 652 (0x28c), region = 44 }
  0x33   : > { %824 = dma.done.wait (%p1106_p1), [#allocation3], 2304   ;;  %p1107_p0 = pmov %p1106_p1 }
  0x34   : > { %p271_p5 = scmp.lt.s32.totalorder %s917_s25, 1  ;;  %v850_v0 = vmov 0.0   ;;  %vm851_vm0 = vmmov 0   ;;  %vm282_vm1 = vcmask 64512   ;;  %v280_v1 = vld [vmem:[%s1093_s2] sm:$0xff]  ;;  %vm370_vm2 = vcmask 1043456  }
  0x35   : > { %826 = vsyncadd (%p1107_p0), [#allocation3], 4294964992  ;;  %683 = vmatprep.subr.mxu0 %v850_v0  ;;  %685 = vmatprep.mubr.msk.f32.mxu0 %vm851_vm0, %v850_v0  ;;  %v358_v5 = vlaneseq  ;;  %v281_v7 = vld [vmem:[%s1094_s3] sm:$0x1]  ;;  %vm366_vm3 = vcmask 31744   ;;  %s852_s10 = smov 16  }
  0x36   : > { %s272_s12 = scalar_select %p271_p5, %s917_s25, 1  ;;  %439 = vmatprep.mubr.f32.mxu1 %v850_v0  ;;  %684 = vmatpush3.msra.mxu0 %v280_v1  ;;  %v357_v13 = vld [vmem:[%s1095_s4] sm:$0xff]  ;;  %v467_v25 = vld [vmem:[#allocation2 + $0x10] sm:$0xff]  ;;  %v468_v26 = vld [vmem:[#allocation2 + $0x18] sm:$0xff] }
  0x37   : > { %v359_v6 = vshrl.u32 %v358_v5, 7  ;;  %s854_s13 = smov 15   ;;  %s855_s11 = smov 1   ;;  %v1016_v20 = vand.u32 127, %v358_v5  ;;  %v455_v29 = vld [vmem:[#allocation2] sm:$0xff]  ;;  %v456_v30 = vld [vmem:[#allocation2 + $0x8] sm:$0xff] }
  0x38   : > { %s273_s9 = scalar_lea.vmem %s1091_s0, %s272_s12  ;;  %s679_s16 = sshll.u32 %s272_s12, 3  ;;  %v481_v33 = vld [vmem:[#allocation2 + $0x20] sm:$0xff]  ;;  %v482_v34 = vld [vmem:[#allocation2 + $0x28] sm:$0xff]  ;;  %v495_v43 = vld [vmem:[#allocation2 + $0x30] sm:$0xff] }
  0x39   : > { %v279_v2 = vld [vmem:[%s273_s9] sm:$0x1]  ;;  %s278_s19 = scalar_lea.vmem %s1092_s1, %s679_s16  ;;  %v360_v10 = vsub.s32 0, %v359_v6  ;;  %s853_s12 = smov 17   ;;  %vm463_vm4 = vcmp.lt.s32.totalorder %v1016_v20, 16  ;;  %vm477_vm5 = vcmp.lt.s32.totalorder %v1016_v20, 15 }
  0x3a   : > { %686 = vmatmul.mubr.msk.f32.vlgmr.msra.gmra.mrb[0].mxu0 %vm282_vm1, %v279_v2  ;;  %v363_v3 = vld [vmem:[%s278_s19] sm:$0xff]  ;;  %s856_s9 = smov 127   ;;  %s857_s14 = smov 113   ;;  %vm452_vm6 = vcmp.lt.s32.totalorder %v1016_v20, 17  ;;  %vm491_vm7 = vcmp.lt.s32.totalorder %v1016_v20, 1  ;;  %v496_v44 = vld [vmem:[#allocation2 + $0x38] sm:$0xff] }
  0x3b   : > { %v365_v4 = vcombine.high %v363_v3, %v363_v3  ;;  %s858_s15 = smov 112   ;;  %s859_s16 = smov 111   ;;  %vm512_vm8 = vcmp.lt.s32.totalorder %v1016_v20, 127  ;;  %v502_v53 = vld [vmem:[#allocation2 + $0x40] sm:$0xff]  ;;  %v503_v54 = vld [vmem:[#allocation2 + $0x48] sm:$0xff]  ;;  %vm526_vm9 = vcmp.lt.s32.totalorder %v1016_v20, 113 }
  0x3c   : > { %v516_v59 = vld [vmem:[#allocation2 + $0x50] sm:$0xff]  ;;  %v517_v60 = vld [vmem:[#allocation2 + $0x58] sm:$0xff]  ;;  %s268_s17 = sand.u32 1, %s837_s22   ;;  %v530_v5 = vld [vmem:[#allocation2 + $0x60] sm:$0xff]  ;;  %vm540_vm10 = vcmp.lt.s32.totalorder %v1016_v20, 112  ;;  %vm554_vm11 = vcmp.lt.s32.totalorder %v1016_v20, 111 }
  0x3d   : > { %671 = vmatprep.subr.msk.mxu1 %vm370_vm2, %v365_v4  ;;  %v531_v6 = vld [vmem:[#allocation2 + $0x68] sm:$0xff]  ;;  %s667_s18 = sshll.u32 %s268_s17, 4  ;;  %s680_s19 = sshll.u32 %s917_s25, 8 }
  0x3e   : > { %672 = vmatpush1.msk.msra.mxu1 %vm370_vm2, %v363_v3  ;;  %s270_s20 = scalar_lea.vmem [#allocation5], %s667_s18  ;;  %s567_s25 = scalar_lea.sflag [#allocation4], %s268_s17 }
  0x3f   : > { %s581_s26 = sshll.u32 %s270_s20, 4  ;;  %p1108_p9 = scmp.ne.s32.totalorder %s1101_s7, 0  ;;  %s1049_s26 = int_to_ptr.vmem [resolvable:$true] %s581_s26 }
 0x10d   : > { %v352_v8 = vpop.f32.mrb[0].mxu0 }
 0x10e   : > { %v353_v9 = vadd.f32 %v352_v8, %v281_v7  ;;  %v687_v11 = vpop.f32.mrb[1].mxu0 }
 0x110   : > { %v356_v12 = vmul.f32 0.16666667, %v353_v9 }
 0x112   : > { %v361_v14 = vrot.slane %v356_v12, %v360_v10 }
 0x114   : > { %v362_v15 = vmul.f32 %v361_v14, %v357_v13  ;;  %v544_v13 = vld [vmem:[#allocation2 + $0x70] sm:$0xff]  ;;  %v545_v14 = vld [vmem:[#allocation2 + $0x78] sm:$0xff] }
 0x116   : > { %673 = vmatmul.mubr.msk.f32.vlgmr.msra.gmra.mrb[0].mxu1 %vm366_vm3, %v362_v15 }
 0x1e9   : > { %v996_v16 = vpop.f32.mrb[0].mxu1 }
 0x1ea   : > { %459 = vrot.lane.b32.xlu1 %v996_v16, %s852_s10  ;;  %446 = vrot.lane.b32.xlu0 %v996_v16, %s853_s12  ;;  %v1000_v17 = vpop.f32.mrb[1].mxu1  ;;  %v504_v1 = vmul.f32 %v502_v53, %v996_v16 }
 0x1eb   : > { %v505_v2 = vmul.f32 %v503_v54, %v1000_v17 }
 0x1ee   : > { %473 = vrot.lane.b32.xlu0 %v996_v16, %s854_s13  ;;  %461 = vrot.lane.b32.xlu1 %v1000_v17, %s852_s10  ;;  %s1047_s10 = scalar_lea.hbm %s1097_s6, %s680_s19 }
 0x1f2   : > { %487 = vrot.lane.b32.xlu0 %v996_v16, %s855_s11  ;;  %475 = vrot.lane.b32.xlu1 %v1000_v17, %s854_s13  ;;  %s860_s13 = smov [#allocation5]  }
 0x1f6   : > { %489 = vrot.lane.b32.xlu1 %v1000_v17, %s855_s11  ;;  %448 = vrot.lane.b32.xlu0 %v1000_v17, %s853_s12  ;;  %s779_s12 = scalar_lea.vmem %s1049_s26, 256  ;;  %s783_s11 = sshll.u32 %s860_s13, 4  ;;  %s784_s11 = int_to_ptr.vmem [resolvable:$false] %s783_s11 }
 0x1f7   : > { %p780_p6 = scmp.ne.s32.totalorder %s1049_s26, %s779_s12  ;;  %p786_p2 = scmp.lt.s32.totalorder %s1049_s26, %s784_s11 }
 0x1f9   : > { %p781_p10 = pnand %p780_p6, %p1108_p9 }
 0x1fa   : > { %510 = vrot.lane.b32.xlu1 %v1000_v17, %s856_s9  ;;  %508 = vrot.lane.b32.xlu0 %v996_v16, %s856_s9  ;;  %s785_s9 = scalar_lea.vmem %s784_s11, 512 }
 0x1fb   : > { %p782_p12 = pneg %p781_p10  ;;  %p787_p3 = scmp.lt.s32.totalorder %s785_s9, %s779_s12 }
 0x1fd   : > { %p788_p4 = por %p787_p3, %p786_p2 }
 0x1fe   : > { %524 = vrot.lane.b32.xlu1 %v1000_v17, %s857_s14  ;;  %522 = vrot.lane.b32.xlu0 %v996_v16, %s857_s14 }
 0x1ff   : > { %p789_p7 = pnand %p788_p4, %p782_p12 }
 0x202   : > { %538 = vrot.lane.b32.xlu1 %v1000_v17, %s858_s15  ;;  %536 = vrot.lane.b32.xlu0 %v996_v16, %s858_s15 }
 0x206   : > { %552 = vrot.lane.b32.xlu1 %v1000_v17, %s859_s16  ;;  %550 = vrot.lane.b32.xlu0 %v996_v16, %s859_s16 }
 0x25c   : > { %v460_v18 = vpop.permute.xlu1 %459  ;;  %v447_v19 = vpop.permute.xlu0 %446 }
 0x260   : > { %v474_v21 = vpop.permute.xlu0 %473  ;;  %v462_v22 = vpop.permute.xlu1 %461 }
 0x261   : > { %v464_v27 = vsel %vm463_vm4, %v460_v18, %v462_v22  ;;  %v465_v28 = vsel %vm463_vm4, %v462_v22, %v460_v18 }
 0x262   : > { %v469_v39 = vmul.f32 %v467_v25, %v465_v28  ;;  %v470_v40 = vmul.f32 %v468_v26, %v464_v27  ;;  %v558_v28 = vld [vmem:[#allocation2 + $0x80] sm:$0xff] }
 0x264   : > { %v488_v23 = vpop.permute.xlu0 %487  ;;  %v476_v24 = vpop.permute.xlu1 %475 }
 0x265   : > { %v478_v35 = vsel %vm477_vm5, %v474_v21, %v476_v24  ;;  %v479_v36 = vsel %vm477_vm5, %v476_v24, %v474_v21 }
 0x266   : > { %v483_v47 = vmul.f32 %v481_v33, %v479_v36  ;;  %v484_v48 = vmul.f32 %v482_v34, %v478_v35 }
 0x268   : > { %v490_v31 = vpop.permute.xlu1 %489  ;;  %v449_v32 = vpop.permute.xlu0 %448 }
 0x269   : > { %v453_v37 = vsel %vm452_vm6, %v447_v19, %v449_v32  ;;  %v454_v38 = vsel %vm452_vm6, %v449_v32, %v447_v19  ;;  %v492_v45 = vsel %vm491_vm7, %v488_v23, %v490_v31  ;;  %v493_v46 = vsel %vm491_vm7, %v490_v31, %v488_v23 }
 0x26a   : > { %v457_v41 = vmul.f32 %v455_v29, %v454_v38  ;;  %v458_v42 = vmul.f32 %v456_v30, %v453_v37  ;;  %v497_v55 = vmul.f32 %v495_v43, %v493_v46  ;;  %v498_v56 = vmul.f32 %v496_v44, %v492_v45  ;;  %v559_v29 = vld [vmem:[#allocation2 + $0x88] sm:$0xff] }
 0x26c   : > { %v471_v49 = vadd.f32 %v469_v39, %v457_v41  ;;  %v472_v50 = vadd.f32 %v470_v40, %v458_v42  ;;  %v511_v51 = vpop.permute.xlu1 %510  ;;  %v509_v52 = vpop.permute.xlu0 %508 }
 0x26d   : > { %v513_v61 = vsel %vm512_vm8, %v509_v52, %v511_v51  ;;  %v514_v62 = vsel %vm512_vm8, %v511_v51, %v509_v52 }
 0x26e   : > { %v485_v57 = vadd.f32 %v483_v47, %v471_v49  ;;  %v486_v58 = vadd.f32 %v484_v48, %v472_v50  ;;  %v518_v11 = vmul.f32 %v516_v59, %v513_v61  ;;  %v519_v12 = vmul.f32 %v517_v60, %v514_v62 }
 0x270   : > { %v499_v63 = vadd.f32 %v497_v55, %v485_v57  ;;  %v500_v0 = vadd.f32 %v498_v56, %v486_v58  ;;  %v525_v3 = vpop.permute.xlu1 %524  ;;  %v523_v4 = vpop.permute.xlu0 %522 }
 0x271   : > { %v527_v7 = vsel %vm526_vm9, %v523_v4, %v525_v3  ;;  %v528_v8 = vsel %vm526_vm9, %v525_v3, %v523_v4 }
 0x272   : > { %v506_v9 = vadd.f32 %v504_v1, %v499_v63  ;;  %v507_v10 = vadd.f32 %v505_v2, %v500_v0  ;;  %v532_v17 = vmul.f32 %v530_v5, %v527_v7  ;;  %v533_v18 = vmul.f32 %v531_v6, %v528_v8 }
 0x274   : > { %v520_v15 = vadd.f32 %v518_v11, %v506_v9  ;;  %v521_v16 = vadd.f32 %v519_v12, %v507_v10  ;;  %v539_v19 = vpop.permute.xlu1 %538  ;;  %v537_v21 = vpop.permute.xlu0 %536 }
 0x275   : > { %v541_v22 = vsel %vm540_vm10, %v537_v21, %v539_v19  ;;  %v542_v23 = vsel %vm540_vm10, %v539_v19, %v537_v21 }
 0x276   : > { %v534_v24 = vadd.f32 %v532_v17, %v520_v15  ;;  %v535_v25 = vadd.f32 %v533_v18, %v521_v16  ;;  %v546_v26 = vmul.f32 %v544_v13, %v541_v22  ;;  %v547_v27 = vmul.f32 %v545_v14, %v542_v23 }
 0x278   : > { %v548_v30 = vadd.f32 %v546_v26, %v534_v24  ;;  %v549_v31 = vadd.f32 %v547_v27, %v535_v25  ;;  %v553_v32 = vpop.permute.xlu1 %552  ;;  %v551_v33 = vpop.permute.xlu0 %550 }
 0x279   : > { %v555_v34 = vsel %vm554_vm11, %v551_v33, %v553_v32  ;;  %v556_v35 = vsel %vm554_vm11, %v553_v32, %v551_v33 }
 0x27a   : > { %v560_v36 = vmul.f32 %v558_v28, %v555_v34  ;;  %v561_v37 = vmul.f32 %v559_v29, %v556_v35 }
 0x27c   : > { %v562_v20 = vadd.f32 %v560_v36, %v548_v30  ;;  %v563_v38 = vadd.f32 %v561_v37, %v549_v31 }
 0x27e   : > { %564 = vst [vmem:[%s270_s20] sm:$0xff] %v562_v20  ;;  %565 = vst [vmem:[%s270_s20 + $0x8] sm:$0xff] %v563_v38 }
 0x27f   : > { %792 = shalt.err (!%p789_p7)
}
 0x280   : > { %s793_s14 = scalar_lea.hbm %s1047_s10, 256  ;;  %s797_s17 = scalar_lea.hbm %s1097_s6, 512 }
 0x281   : > { %p794_p8 = scmp.ne.s32.totalorder %s1047_s10, %s793_s14  ;;  %p798_p1 = scmp.lt.u32.totalorder %s1047_s10, %s1097_s6 }
 0x282   : > { %p799_p0 = scmp.lt.u32.totalorder %s797_s17, %s793_s14  ;;  %p801_p6 = scmp.lt.u32.totalorder %s793_s14, %s1047_s10 }
 0x283   : > { %p795_p11 = pnand %p794_p8, %p1108_p9 }
 0x284   : > { %p800_p5 = por %p799_p0, %p798_p1 }
 0x285   : > { %p796_p13 = pneg %p795_p11 }
 0x286   : > { %p802_p10 = por %p801_p6, %p800_p5 }
 0x288   : > { %p803_p12 = pnand %p802_p10, %p796_p13 }
 0x28a   : > { %806 = shalt.err (!%p803_p12)
}
 0x28b   : > { %692 = dma.vmem_to_hbm [thread:$0]  (%p1108_p9), %s1049_s26, 256, %s1047_s10, %s567_s25  }
 0x28c PF: > { %p704_p2 = scmp.ge.s32.totalorder %s845_s24, 2  ;;  %s593_s20 = sand.u32 1, %s833_s21  }
 0x28d   : > { %p1109_p3 = scmp.ne.s32.totalorder %s1102_s8, 0  ;;  %s594_s28 = scalar_lea.sflag [#allocation4], %s593_s20 }
 0x28f   : > { %p699_p4 = pnand %p704_p2, %p1109_p3 }
 0x291   : > { %828 = dma.done.wait (!%p699_p4), %s594_s28, 256  }
 0x292   : > { %830 = vsyncadd (!%p699_p4), %s594_s28, 4294967040  ;;  %p17_p7 = scmp.ge.s32.totalorder %s921_s27, 4   ;;  %s1110_s21 = smov %s837_s22 }
 0x293   : > { %s1111_s22 = smov %s841_s23  ;;  %s1112_s23 = smov %s932_s30 }
 0x294   : > { %s1113_s24 = smov %s921_s27  ;;  %19 = sbr.rel (!%p17_p7) target bundleno = 4 (0x4), region = 95 }
 0x29b   :  { %599 = vsyncpa [#allocation3], 1 }
 0x29c   :  { %601 = vsyncpa [#allocation3 + $0x1], 1 }
 0x29d   :  { %602 = vsyncpa [#allocation4], 1 }
 0x29e   :  { %604 = vsyncpa [#allocation4 + $0x1], 1 }

</bundles_post_ra>
